<compile_context>
chip_gen: v5e
topology: v5e:2x2
jax: 0.10.0
libtpu: 0.0.40
codegen_flags: <defaults>
</compile_context>

<pallas_src>
import jax
import jax.numpy as jnp
from jax.experimental import pallas as pl
from jax.experimental.pallas import tpu as pltpu


def _wn_head_kernel(x_ref, vt_ref, sb_ref, o_ref):
    # x_ref : (TM, D)  f32   (cast to bf16 here; keeps HBM traffic to one pass)
    # vt_ref: (D, TC)  bf16  (v transposed, wrapper-side)
    # sb_ref: (2, TC)  f32   row 0 = scale (g/||v||), row 1 = bias
    # o_ref : (TM, TC) out_dtype
    acc = jnp.dot(
        x_ref[...].astype(jnp.bfloat16),
        vt_ref[...],
        preferred_element_type=jnp.float32,
    )                                                   # (TM, TC) f32, MXU
    sb = sb_ref[...]
    scale = sb[0:1, :]                                  # (1, TC) f32
    bias = sb[1:2, :]                                   # (1, TC) f32
    o_ref[...] = (acc * scale + bias).astype(o_ref.dtype)


def _round_up(n, m):
    return ((n + m - 1) // m) * m


def _device_kind():
    try:
        return jax.devices()[0].device_kind.lower()
    except Exception:
        return ""


def sfda_classifier_forward(x, v, g, b, *, tm=None, tc=None, out_dtype=None):
    """Weight-normalized linear classifier head (forward pass).

    x: (B, D) float32            -- bottleneck features
    v: (C, D) float32            -- weight_v (PyTorch Linear weight layout)
    g: (C, 1) float32            -- weight_g
    b: (1, C) or (C,) float32    -- bias
    returns (B, C) in out_dtype (default: x.dtype)
    """
    B, D = x.shape
    C = v.shape[0]
    out_dtype = x.dtype if out_dtype is None else out_dtype

    kind = _device_kind()
    is_v5e = ("v5 lite" in kind) or ("v5e" in kind) or ("v5lite" in kind)
    is_v7 = "v7" in kind

    # ---- tile selection -----------------------------------------------------
    # tc: 256 fills the v6e/v7x MXU N dimension; v5e's MXU is 128-wide so 256
    # only adds vreg/VMEM pressure there.  Always clamp to the padded C extent.
    if tc is None:
        tc = 128 if is_v5e else 256
    tc = min(tc, _round_up(C, 128))
    c_pad = _round_up(C, tc)

    # tm: large tiles amortize the ~0.35 us/grid-step overhead; clamp for small B.
    if tm is None:
        tm = 512
    tm = min(tm, _round_up(B, 8))
    b_pad = _round_up(B, tm)

    # v7x has 2 TensorCores: if the class axis collapsed to one tile, make sure
    # the batch axis has >=2 tiles so megacore sharding has work to split.
    if is_v7 and (c_pad // tc) == 1 and (b_pad // tm) < 2 and _round_up(B, 8) > 8:
        tm = _round_up(pl.cdiv(b_pad, 2), 8)
        b_pad = _round_up(B, tm)

    # ---- wrapper-side weight prep (layout plumbing, outside the hot kernel) --
    xp = x
    if b_pad != B:
        xp = jnp.pad(xp, ((0, b_pad - B), (0, 0)))

    # Hoisted weight-norm scale, computed in f32 from the original v.
    vf = v.astype(jnp.float32)
    sq = jnp.sum(vf * vf, axis=-1)                                  # (C,) f32
    scale = jnp.reshape(g, (-1,)).astype(jnp.float32) * jax.lax.rsqrt(sq)
    bias = jnp.reshape(b, (-1,)).astype(jnp.float32)
    sb = jnp.stack([scale, bias], axis=0)                           # (2, C) f32
    # NOTE: genuine zero-norm rows give inf/nan here, matching PyTorch's 0/0;
    # padded columns below get scale 0 and are sliced away.

    vp = v
    if c_pad != C:
        vp = jnp.pad(vp, ((0, c_pad - C), (0, 0)))
        sb = jnp.pad(sb, ((0, 0), (0, c_pad - C)))
    vt = vp.astype(jnp.bfloat16).T                                  # (D, c_pad)

    grid = (b_pad // tm, c_pad // tc)

    out = pl.pallas_call(
        _wn_head_kernel,
        out_shape=jax.ShapeDtypeStruct((b_pad, c_pad), out_dtype),
        grid_spec=pltpu.PrefetchScalarGridSpec(
            num_scalar_prefetch=0,
            grid=grid,
            in_specs=[
                pl.BlockSpec((tm, D), lambda i, j: (i, 0)),   # x   (f32)
                pl.BlockSpec((D, tc), lambda i, j: (0, j)),   # vT  (bf16)
                pl.BlockSpec((2, tc), lambda i, j: (0, j)),   # [scale; bias]
            ],
            out_specs=pl.BlockSpec((tm, tc), lambda i, j: (i, j)),
        ),
        compiler_params=pltpu.CompilerParams(
            dimension_semantics=("parallel", "parallel"),
        ),
    )(xp, vt, sb)

    return out[:B, :C]


def _reference(x, v, g, b):
    norm = jnp.sqrt(jnp.sum(v * v, axis=-1, keepdims=True))
    w = g * v / norm
    return x @ w.T + jnp.reshape(b, (1, -1))


if __name__ == "__main__":
    # Small shapes consistent with the module: bottleneck_dim=256, num_class=16.
    B, D, C = 8, 256, 16

    key = jax.random.PRNGKey(0)
    kx, kv = jax.random.split(key, 2)

    x = jax.random.normal(kx, (B, D), dtype=jnp.float32)

    # Synthetic xavier-ish init; weight_g = row norm of weight_v (as weight_norm
    # sets at wrap time); Linear bias zeroed by init_weights.
    w_scale = (2.0 / (D + C)) ** 0.5
    v = w_scale * jax.random.normal(kv, (C, D), dtype=jnp.float32)
    g = jnp.sqrt(jnp.sum(v * v, axis=-1, keepdims=True))       # (C, 1)
    b = jnp.zeros((1, C), dtype=jnp.float32)

    out = sfda_classifier_forward(x, v, g, b)
    out = jax.block_until_ready(out)

    ref = _reference(x, v, g, b)
    assert out.shape == (B, C)
    # bf16 matmul operands (f32 accumulate, f32 scale/bias) vs f32 reference.
    assert jnp.allclose(out, ref, atol=5e-2, rtol=5e-2), float(
        jnp.max(jnp.abs(out - ref))
    )

    print("KERNEL_OK")
</pallas_src>

<mosaic_0001>
module attributes {stable_mosaic.version = 11 : i64} {
  func.func @_wn_head_kernel(%arg0: i32, %arg1: i32, %arg2: memref<8x256xf32, #tpu.memory_space<vmem>>, %arg3: memref<256x128xbf16, #tpu.memory_space<vmem>>, %arg4: memref<2x128xf32, #tpu.memory_space<vmem>>, %arg5: memref<8x128xf32, #tpu.memory_space<vmem>>) attributes {dimension_semantics = [#tpu.dimension_semantics<parallel>, #tpu.dimension_semantics<parallel>], iteration_bounds = array<i64: 1, 1>, scalar_prefetch = 0 : i64, scratch_operands = 0 : i64, tpu.core_type = #tpu.core_type<tc>, window_params = [{transform_indices = @transform_0, window_bounds = array<i64: 8, 256>}, {transform_indices = @transform_1, window_bounds = array<i64: 256, 128>}, {transform_indices = @transform_2, window_bounds = array<i64: 2, 128>}, {transform_indices = @transform_3, window_bounds = array<i64: 8, 128>}]} {
    %c0 = arith.constant 0 : index
    %c0_0 = arith.constant 0 : index
    %0 = vector.load %arg2[%c0, %c0_0] : memref<8x256xf32, #tpu.memory_space<vmem>>, vector<8x256xf32>
    %1 = arith.truncf %0 : vector<8x256xf32> to vector<8x256xbf16>
    %c0_1 = arith.constant 0 : index
    %c0_2 = arith.constant 0 : index
    %2 = vector.load %arg3[%c0_1, %c0_2] : memref<256x128xbf16, #tpu.memory_space<vmem>>, vector<256x128xbf16>
    %cst = arith.constant dense<0.000000e+00> : vector<8x128xf32>
    %3 = tpu.matmul %1, %2, %cst {dimension_numbers = #tpu.dot_dimension_numbers<[1], [0], [0], [1], [0, 0, 1, 1], [], []>} : vector<8x256xbf16>, vector<256x128xbf16>, vector<8x128xf32> -> vector<8x128xf32>
    %c0_3 = arith.constant 0 : index
    %c0_4 = arith.constant 0 : index
    %4 = vector.load %arg4[%c0_3, %c0_4] : memref<2x128xf32, #tpu.memory_space<vmem>>, vector<2x128xf32>
    %5 = vector.extract_strided_slice %4 {offsets = [0, 0], sizes = [1, 128], strides = [1, 1]} : vector<2x128xf32> to vector<1x128xf32>
    %6 = vector.extract_strided_slice %4 {offsets = [1, 0], sizes = [1, 128], strides = [1, 1]} : vector<2x128xf32> to vector<1x128xf32>
    %7 = vector.broadcast %5 : vector<1x128xf32> to vector<8x128xf32>
    %8 = arith.mulf %3, %7 : vector<8x128xf32>
    %9 = vector.broadcast %6 : vector<1x128xf32> to vector<8x128xf32>
    %10 = arith.addf %8, %9 : vector<8x128xf32>
    %c0_5 = arith.constant 0 : index
    %c0_6 = arith.constant 0 : index
    %11 = vector.load %arg5[%c0_5, %c0_6] : memref<8x128xf32, #tpu.memory_space<vmem>>, vector<8x128xf32>
    tpu.vector_store %arg5[%c0_5, %c0_6], %10 {strides = array<i32>} : memref<8x128xf32, #tpu.memory_space<vmem>>, vector<8x128xf32>,
    return
  }
  func.func @transform_0(%arg0: i32, %arg1: i32) -> (i32, i32) {
    %c0_i32 = arith.constant 0 : i32
    %c0_i32_0 = arith.constant 0 : i32
    return %arg0, %c0_i32 : i32, i32
  }
  func.func @transform_1(%arg0: i32, %arg1: i32) -> (i32, i32) {
    %c0_i32 = arith.constant 0 : i32
    %c0_i32_0 = arith.constant 0 : i32
    return %c0_i32, %arg1 : i32, i32
  }
  func.func @transform_2(%arg0: i32, %arg1: i32) -> (i32, i32) {
    %c0_i32 = arith.constant 0 : i32
    %c0_i32_0 = arith.constant 0 : i32
    return %c0_i32, %arg1 : i32, i32
  }
  func.func @transform_3(%arg0: i32, %arg1: i32) -> (i32, i32) {
    %c0_i32 = arith.constant 0 : i32
    return %arg0, %arg1 : i32, i32
  }
}

</mosaic_0001>

<bundles_post_ra>
// kernel: tpu_custom_call.1
= control target key start
LH: loop header
LB: loop body
LE: loop exit
PB: predicated region body
PF: predicated region fallthrough
CT: control target
= control target key end

     0   :  { %8 = vsyncpa [#allocation3], 0  ;;  %s466_s0 = inlined_call_operand.hbm [shape: f32[8,256], index: 0, kind: input, shape index: {}]   ;;  %s467_s1 = inlined_call_operand.hbm [shape: bf16[256,128], index: 1, kind: input, shape index: {}]   ;;  %s468_s2 = inlined_call_operand.hbm [shape: f32[2,128], index: 2, kind: input, shape index: {}]   ;;  %s469_s3 = inlined_call_operand.hbm [shape: f32[8,128], index: 3, kind: output, shape index: {}]  }
   0x1   :  { %9 = vsyncpa [#allocation6], 0  ;;  %s26_s14 = sshll.u32 %s467_s1, 4  ;;  %s27_s14 = int_to_ptr.hbm [resolvable:$true] %s26_s14 }
   0x2   :  { %10 = vsyncpa [#allocation4], 0  ;;  %s428_s15 = smov [#allocation5]   ;;  %s16_s19 = sshll.u32 %s466_s0, 4  ;;  %s17_s19 = int_to_ptr.hbm [resolvable:$true] %s16_s19 }
   0x3   :  { %s28_s16 = sshll.u32 %s428_s15, 4  ;;  %s429_s20 = smov 64   ;;  %s29_s16 = int_to_ptr.vmem [resolvable:$true] %s28_s16 }
   0x4   :  { %s430_s21 = smov 4   ;;  %s431_s22 = smov [#allocation2]  }
   0x5   :  { %34 = dma.hbm_to_vmem [thread:$0]  %s27_s14, 2048, %s29_s16, [#allocation6], %s429_s20, %s429_s20, %s430_s21  }
   0x6   :  { %s18_s23 = sshll.u32 %s431_s22, 4  ;;  %s40_s26 = sshll.u32 %s468_s2, 4  ;;  %s19_s23 = int_to_ptr.vmem [resolvable:$true] %s18_s23  ;;  %s41_s26 = int_to_ptr.hbm [resolvable:$true] %s40_s26 }
   0x7   :  { %21 = dma.hbm_to_vmem [thread:$0]  %s17_s19, 256, %s19_s23, [#allocation3]  }
   0x8   :  { %s432_s1 = smov [#allocation7]  }
   0x9   :  { %s42_s27 = sshll.u32 %s432_s1, 4  ;;  %s43_s27 = int_to_ptr.vmem [resolvable:$true] %s42_s27 }
   0xa   :  { %45 = dma.hbm_to_vmem [thread:$0]  %s41_s26, 32, %s43_s27, [#allocation6]  }
   0xb   :  { %422 = dma.done.wait [#allocation3], 256  }
   0xc   :  { %423 = vsyncadd [#allocation3], 4294967040 }
   0xd   :  { %424 = dma.done.wait [#allocation6], 2080  }
   0xe   :  { %425 = vsyncadd [#allocation6], 4294965216  ;;  %v311_v0 = vld [vmem:[#allocation5 + $0x38] sm:$0xff]  ;;  %v310_v2 = vld [vmem:[#allocation5 + $0x30] sm:$0xff]  ;;  %s433_s0 = smov [#allocation8]   ;;  %s229_s30 = sshll.u32 %s469_s3, 4  ;;  %s230_s30 = int_to_ptr.hbm [resolvable:$true] %s229_s30 }
   0xf   :  { %v319_v1 = vld [vmem:[#allocation5 + $0x78] sm:$0xff]  ;;  %190 = vmatpush.bf16.msra.mxu0 %v311_v0  ;;  %v318_v3 = vld [vmem:[#allocation5 + $0x70] sm:$0xff]  ;;  %v309_v4 = vld [vmem:[#allocation5 + $0x28] sm:$0xff]  ;;  %s227_s2 = sshll.u32 %s433_s0, 4  ;;  %s228_s2 = int_to_ptr.vmem [resolvable:$true] %s227_s2 }
  0x10   :  { %203 = vmatpush.bf16.msra.mxu1 %v319_v1  ;;  %v317_v5 = vld [vmem:[#allocation5 + $0x68] sm:$0xff]  ;;  %v308_v6 = vld [vmem:[#allocation5 + $0x20] sm:$0xff]  ;;  %v307_v8 = vld [vmem:[#allocation5 + $0x18] sm:$0xff] }
  0x11   :  { %v316_v7 = vld [vmem:[#allocation5 + $0x60] sm:$0xff]  ;;  %v315_v9 = vld [vmem:[#allocation5 + $0x58] sm:$0xff]  ;;  %v306_v10 = vld [vmem:[#allocation5 + $0x10] sm:$0xff] }
  0x12   :  { %v314_v11 = vld [vmem:[#allocation5 + $0x50] sm:$0xff]  ;;  %v305_v12 = vld [vmem:[#allocation5 + $0x8] sm:$0xff]  ;;  %v304_v14 = vld [vmem:[#allocation5] sm:$0xff] }
  0x13   :  { %191 = vmatpush.bf16.msra.mxu0 %v310_v2  ;;  %v313_v13 = vld [vmem:[#allocation5 + $0x48] sm:$0xff]  ;;  %v312_v15 = vld [vmem:[#allocation5 + $0x40] sm:$0xff]  ;;  %v58_v16 = vld [vmem:[#allocation2] sm:$0xff] }
  0x14   :  { %204 = vmatpush.bf16.msra.mxu1 %v318_v3  ;;  %v59_v17 = vld [vmem:[#allocation2 + $0x8] sm:$0xff]  ;;  %v60_v18 = vpack.c.bf16 %v58_v16, %v58_v16  ;;  %v216_v20 = vld [vmem:[#allocation7] sm:$0x3] }
  0x15   :  { %v61_v19 = vpack.c.bf16 %v59_v17, %v59_v17  ;;  %v217_v21 = vperm.slane %v216_v20, 0  ;;  %v219_v25 = vperm.slane %v216_v20, 1 }
  0x17   :  { %192 = vmatpush.bf16.msra.mxu0 %v309_v4 }
  0x18   :  { %205 = vmatpush.bf16.msra.mxu1 %v317_v5 }
  0x1b   :  { %193 = vmatpush.bf16.msra.mxu0 %v308_v6 }
  0x1c   :  { %206 = vmatpush.bf16.msra.mxu1 %v316_v7 }
  0x1f   :  { %194 = vmatpush.bf16.msra.mxu0 %v307_v8 }
  0x20   :  { %207 = vmatpush.bf16.msra.mxu1 %v315_v9 }
  0x23   :  { %195 = vmatpush.bf16.msra.mxu0 %v306_v10 }
  0x24   :  { %208 = vmatpush.bf16.msra.mxu1 %v314_v11 }
  0x27   :  { %196 = vmatpush.bf16.msra.mxu0 %v305_v12 }
  0x28   :  { %209 = vmatpush.bf16.msra.mxu1 %v313_v13 }
  0x2b   :  { %197 = vmatpush.bf16.msra.mxu0 %v304_v14 }
  0x2c   :  { %210 = vmatpush.bf16.msra.mxu1 %v312_v15 }
  0x2e   :  { %198 = vmatmul.bf16.vlgmr.msra.gmra.mxu0 %v60_v18 }
  0x2f   :  { %211 = vmatmul.bf16.vlgmr.msra.gmra.mxu1 %v61_v19 }
  0xab   :  { %v199_v22 = vpop.f32.mrf.mxu0 }
  0xac   :  { %v212_v23 = vpop.f32.mrf.mxu1 }
  0xad   :  { %v213_v24 = vadd.f32 %v212_v23, %v199_v22 }
  0xaf   :  { %v218_v26 = vmul.f32 %v217_v21, %v213_v24 }
  0xb1   :  { %v220_v27 = vadd.f32 %v219_v25, %v218_v26 }
  0xb3   :  { %221 = vst [vmem:[#allocation8] sm:$0xff] %v220_v27  ;;  %v201_v28 = vpop.f32.mrf.mxu0 }
  0xb4   :  { %v214_v29 = vpop.f32.mrf.mxu1  ;;  %232 = dma.vmem_to_hbm [thread:$0]  %s228_s2, 128, %s230_s30, [#allocation4]  }
  0xb5   :  { %426 = dma.done.wait [#allocation4], 128  }
  0xb6   :  { %427 = vsyncadd [#allocation4], 4294967168 }
  0xb7   :  { %237 = vsyncpa [#allocation3], 1 }
  0xb8   :  { %238 = vsyncpa [#allocation6], 1 }
  0xb9   :  { %239 = vsyncpa [#allocation4], 1 }

</bundles_post_ra>
